<compile_context>
chip_gen: v6e
topology: v6e:2x2x1
jax: 0.10.0
libtpu: 0.0.40
codegen_flags: <defaults>
</compile_context>

<pallas_src>
import jax
import jax.numpy as jnp
from jax import lax
from jax.experimental import pallas as pl
from jax.experimental.pallas import tpu as pltpu

SOBEL_X = ((-1.0, 0.0, 1.0),
           (-2.0, 0.0, 2.0),
           (-1.0, 0.0, 1.0))
SOBEL_Y = ((-1.0, -2.0, -1.0),
           ( 0.0,  0.0,  0.0),
           ( 1.0,  2.0,  1.0))


def _color_shift_sobel_kernel(w_ref, img_ref, up_ref, dn_ref, out_ref):
    # w_ref:   SMEM (3, N) folded weights  (w / (wr + wg + wb + 1e-6))
    # img_ref: VMEM (1, 3, TH, W)  current row tile of one image
    # up_ref:  VMEM (1, 3, HB, W)  8-row slab just above the tile (clamped)
    # dn_ref:  VMEM (1, 3, HB, W)  8-row slab just below the tile (clamped)
    # out_ref: VMEM (1, 3, TH, W)  -> [gray_shifted, sobel_gx, sobel_gy]
    n = pl.program_id(0)
    h = pl.program_id(1)
    n_h = pl.num_programs(1)

    TH = img_ref.shape[2]
    W = img_ref.shape[3]
    HB = up_ref.shape[2]

    r = img_ref[0, 0]
    g = img_ref[0, 1]
    b = img_ref[0, 2]

    # Color shift (denominator already folded into the weights on the host side).
    wr = w_ref[0, n]
    wg = w_ref[1, n]
    wb = w_ref[2, n]
    gray = wr * r + wg * g + wb * b

    third = 1.0 / 3.0
    sg = (r + g + b) * third                                  # channel-mean grayscale (TH, W)

    # Halo rows (channel-mean) from the neighbouring tiles; zeroed at the global edges
    # so they behave exactly like zero padding.
    up_row = (up_ref[0, 0, HB - 1:HB, :] + up_ref[0, 1, HB - 1:HB, :]
              + up_ref[0, 2, HB - 1:HB, :]) * third           # (1, W)
    dn_row = (dn_ref[0, 0, 0:1, :] + dn_ref[0, 1, 0:1, :]
              + dn_ref[0, 2, 0:1, :]) * third                 # (1, W)
    up_row = jnp.where(h == 0, jnp.zeros_like(up_row), up_row)
    dn_row = jnp.where(h == n_h - 1, jnp.zeros_like(dn_row), dn_row)

    row = lax.broadcasted_iota(jnp.int32, (TH, W), 0)
    col = lax.broadcasted_iota(jnp.int32, (TH, W), 1)
    first_col = col == 0
    last_col = col == W - 1

    # Vertically shifted grayscale planes with the halo rows spliced in (zero-padded).
    sg_u = jnp.where(row == 0, up_row, pltpu.roll(sg, 1, 0))            # sg[i-1]
    sg_d = jnp.where(row == TH - 1, dn_row, pltpu.roll(sg, TH - 1, 0))  # sg[i+1]

    # Separable 3x3 Sobel (zero padding):
    #   Kx = [1,2,1]^T (x) [-1,0,1]  ->  gx = right(a) - left(a),   a = sg_u + 2*sg + sg_d
    #   Ky = [-1,0,1]^T (x) [1,2,1]  ->  gy = left(b) + 2*b + right(b),  b = sg_d - sg_u
    a = sg_u + 2.0 * sg + sg_d
    bv = sg_d - sg_u

    def left(x):   # out[:, j] = x[:, j-1]; zero-pad at j == 0
        return jnp.where(first_col, 0.0, pltpu.roll(x, 1, 1))

    def right(x):  # out[:, j] = x[:, j+1]; zero-pad at j == W-1
        return jnp.where(last_col, 0.0, pltpu.roll(x, W - 1, 1))

    gx = right(a) - left(a)
    gy = left(bv) + 2.0 * bv + right(bv)

    out_ref[0, 0] = gray.astype(out_ref.dtype)
    out_ref[0, 1] = gx.astype(out_ref.dtype)
    out_ref[0, 2] = gy.astype(out_ref.dtype)


def _pick_tile_h(H, W, target_bytes=4 * 1024 * 1024):
    """Largest TH that divides H, is a multiple of 8 and keeps a (3,TH,W) f32 slab
    under target_bytes. Falls back to TH = H if H is not a multiple of 8."""
    if H % 8 != 0:
        return H
    max_rows = max(8, target_bytes // (12 * W))
    th = 8
    cand = 8
    limit = min(H, max_rows)
    while cand <= limit:
        if H % cand == 0:
            th = cand
        cand += 8
    return th


def color_shift_with_sobel(image, key, weight_mode="uniform"):
    """image: (N, 3, H, W) float32. Returns ((N, 3, H, W) [gray, gx, gy], weights (N, 3))."""
    N, C, H, W = image.shape
    assert C == 3, "ColorShiftWithSobel expects an RGB (C=3) input"

    kr, kg, kb = jax.random.split(key, 3)
    if weight_mode == "uniform":
        wr = jax.random.uniform(kr, (N,), jnp.float32, 0.199, 0.399)
        wg = jax.random.uniform(kg, (N,), jnp.float32, 0.487, 0.687)
        wb = jax.random.uniform(kb, (N,), jnp.float32, 0.014, 0.214)
    elif weight_mode == "normal":
        wr = 0.299 + 0.1 * jax.random.normal(kr, (N,), jnp.float32)
        wg = 0.587 + 0.1 * jax.random.normal(kg, (N,), jnp.float32)
        wb = 0.114 + 0.1 * jax.random.normal(kb, (N,), jnp.float32)
    else:
        raise ValueError("weight_mode must be in ['normal', 'uniform']")
    weights = jnp.stack([wr, wg, wb], axis=1)                       # (N, 3), returned to caller

    # Fold the 1/(wr+wg+wb+eps) denominator into the weights (tiny (N,)-sized host-side op);
    # SMEM layout (3, N) avoids the (N, 3) 2-D SMEM padding blow-up.
    inv = 1.0 / (wr + wg + wb + 1e-6)
    w_folded = jnp.stack([wr * inv, wg * inv, wb * inv], axis=0)    # (3, N)

    TH = _pick_tile_h(H, W)
    HB = 8 if H % 8 == 0 else H        # halo block height (aligned 8-row slab)
    n_h = H // TH
    th_blk = TH // HB                  # tile height measured in HB-row halo blocks
    n_hb = H // HB

    def img_map(n, h):
        return (n, 0, h, 0)

    def up_map(n, h):                  # 8-row slab whose last row is the row above the tile
        return (n, 0, jnp.maximum(h * th_blk - 1, 0), 0)

    def dn_map(n, h):                  # 8-row slab whose first row is the row below the tile
        return (n, 0, jnp.minimum((h + 1) * th_blk, n_hb - 1), 0)

    slab_bytes = 4 * 3 * TH * W
    halo_bytes = 2 * 4 * 3 * HB * W
    vmem_limit = int(max(32 * 1024 * 1024, 2 * (2 * slab_bytes + halo_bytes) + (4 << 20)))

    cost = pl.CostEstimate(
        flops=30 * N * H * W,
        transcendentals=0,
        bytes_accessed=2 * N * 3 * H * W * 4,
    )

    out = pl.pallas_call(
        _color_shift_sobel_kernel,
        out_shape=jax.ShapeDtypeStruct((N, 3, H, W), image.dtype),
        grid=(N, n_h),
        in_specs=[
            pl.BlockSpec(memory_space=pltpu.MemorySpace.SMEM),   # folded weights (3, N)
            pl.BlockSpec((1, 3, TH, W), img_map),                # main row tile
            pl.BlockSpec((1, 3, HB, W), up_map),                 # halo above
            pl.BlockSpec((1, 3, HB, W), dn_map),                 # halo below
        ],
        out_specs=pl.BlockSpec((1, 3, TH, W), img_map),
        compiler_params=pltpu.CompilerParams(
            dimension_semantics=("parallel", "parallel"),
            vmem_limit_bytes=vmem_limit,
        ),
        cost_estimate=cost,
    )(w_folded, image, image, image)
    return out, weights


def _reference(image, weights):
    """Pure-JAX reference mirroring the PyTorch forward (pad + 9-tap conv)."""
    wr = weights[:, 0][:, None, None, None]
    wg = weights[:, 1][:, None, None, None]
    wb = weights[:, 2][:, None, None, None]
    r = image[:, 0:1]
    g = image[:, 1:2]
    b = image[:, 2:3]
    gray = (wr * r + wg * g + wb * b) / (wr + wg + wb + 1e-6)    # (N,1,H,W)

    sg = image.mean(axis=1)                                      # (N,H,W)
    pad = jnp.pad(sg, ((0, 0), (1, 1), (1, 1)))
    kx = jnp.asarray(SOBEL_X, jnp.float32)
    ky = jnp.asarray(SOBEL_Y, jnp.float32)
    H, W = sg.shape[1], sg.shape[2]
    gx = jnp.zeros_like(sg)
    gy = jnp.zeros_like(sg)
    for di in range(3):
        for dj in range(3):
            win = pad[:, di:di + H, dj:dj + W]
            gx = gx + kx[di, dj] * win
            gy = gy + ky[di, dj] * win
    sobel = jnp.stack([gx, gy], axis=1)                          # (N,2,H,W)
    return jnp.concatenate([gray, sobel], axis=1)                # (N,3,H,W)


if __name__ == "__main__":
    key = jax.random.PRNGKey(0)
    k_img, k_w = jax.random.split(key)
    # W = 128 -> lane-dense blocks (full 128-lane vregs, unmasked stores).
    N, C, H, W = 2, 3, 16, 128
    image = jax.random.uniform(k_img, (N, C, H, W), jnp.float32)

    out, weights = color_shift_with_sobel(image, k_w, weight_mode="uniform")
    out = jax.block_until_ready(out)

    ref = _reference(image, weights)
    assert out.shape == (N, 3, H, W)
    assert jnp.allclose(out, ref, atol=1e-5, rtol=1e-5), "mismatch vs reference"
    print("KERNEL_OK")
</pallas_src>

<mosaic_0001>
module attributes {stable_mosaic.version = 11 : i64} {
  func.func @_color_shift_sobel_kernel(%arg0: i32, %arg1: i32, %arg2: memref<3x2xf32, #tpu.memory_space<smem>>, %arg3: memref<1x3x16x128xf32, #tpu.memory_space<vmem>>, %arg4: memref<1x3x8x128xf32, #tpu.memory_space<vmem>>, %arg5: memref<1x3x8x128xf32, #tpu.memory_space<vmem>>, %arg6: memref<1x3x16x128xf32, #tpu.memory_space<vmem>>) attributes {dimension_semantics = [#tpu.dimension_semantics<parallel>, #tpu.dimension_semantics<parallel>], iteration_bounds = array<i64: 2, 1>, scalar_prefetch = 0 : i64, scratch_operands = 0 : i64, tpu.core_type = #tpu.core_type<tc>, window_params = [{transform_indices = @transform_0, window_bounds = array<i64: 3, 2>}, {transform_indices = @transform_1, window_bounds = array<i64: 1, 3, 16, 128>}, {transform_indices = @transform_2, window_bounds = array<i64: 1, 3, 8, 128>}, {transform_indices = @transform_3, window_bounds = array<i64: 1, 3, 8, 128>}, {transform_indices = @transform_4, window_bounds = array<i64: 1, 3, 16, 128>}]} {
    %c0 = arith.constant 0 : index
    %c0_0 = arith.constant 0 : index
    %c0_1 = arith.constant 0 : index
    %c0_2 = arith.constant 0 : index
    %0 = vector.load %arg3[%c0, %c0_0, %c0_1, %c0_2] : memref<1x3x16x128xf32, #tpu.memory_space<vmem>>, vector<1x1x16x128xf32>
    %1 = vector.shape_cast %0 : vector<1x1x16x128xf32> to vector<16x128xf32>
    %c0_3 = arith.constant 0 : index
    %c1 = arith.constant 1 : index
    %c0_4 = arith.constant 0 : index
    %c0_5 = arith.constant 0 : index
    %2 = vector.load %arg3[%c0_3, %c1, %c0_4, %c0_5] : memref<1x3x16x128xf32, #tpu.memory_space<vmem>>, vector<1x1x16x128xf32>
    %3 = vector.shape_cast %2 : vector<1x1x16x128xf32> to vector<16x128xf32>
    %c0_6 = arith.constant 0 : index
    %c2 = arith.constant 2 : index
    %c0_7 = arith.constant 0 : index
    %c0_8 = arith.constant 0 : index
    %4 = vector.load %arg3[%c0_6, %c2, %c0_7, %c0_8] : memref<1x3x16x128xf32, #tpu.memory_space<vmem>>, vector<1x1x16x128xf32>
    %5 = vector.shape_cast %4 : vector<1x1x16x128xf32> to vector<16x128xf32>
    %c0_9 = arith.constant 0 : index
    %6 = arith.index_cast %arg0 : i32 to index
    %7 = memref.load %arg2[%c0_9, %6] : memref<3x2xf32, #tpu.memory_space<smem>>
    %c1_10 = arith.constant 1 : index
    %8 = arith.index_cast %arg0 : i32 to index
    %9 = memref.load %arg2[%c1_10, %8] : memref<3x2xf32, #tpu.memory_space<smem>>
    %c2_11 = arith.constant 2 : index
    %10 = arith.index_cast %arg0 : i32 to index
    %11 = memref.load %arg2[%c2_11, %10] : memref<3x2xf32, #tpu.memory_space<smem>>
    %12 = vector.broadcast %7 : f32 to vector<16x128xf32>
    %13 = arith.mulf %12, %1 : vector<16x128xf32>
    %14 = vector.broadcast %9 : f32 to vector<16x128xf32>
    %15 = arith.mulf %14, %3 : vector<16x128xf32>
    %16 = arith.addf %13, %15 : vector<16x128xf32>
    %17 = vector.broadcast %11 : f32 to vector<16x128xf32>
    %18 = arith.mulf %17, %5 : vector<16x128xf32>
    %19 = arith.addf %16, %18 : vector<16x128xf32>
    %20 = arith.addf %1, %3 : vector<16x128xf32>
    %21 = arith.addf %20, %5 : vector<16x128xf32>
    %cst = arith.constant 0.333333343 : f32
    %22 = vector.broadcast %cst : f32 to vector<16x128xf32>
    %23 = arith.mulf %21, %22 : vector<16x128xf32>
    %c0_12 = arith.constant 0 : index
    %c0_13 = arith.constant 0 : index
    %c7 = arith.constant 7 : index
    %c0_14 = arith.constant 0 : index
    %24 = vector.load %arg4[%c0_12, %c0_13, %c7, %c0_14] : memref<1x3x8x128xf32, #tpu.memory_space<vmem>>, vector<1x1x1x128xf32>
    %25 = vector.shape_cast %24 : vector<1x1x1x128xf32> to vector<1x128xf32>
    %c0_15 = arith.constant 0 : index
    %c1_16 = arith.constant 1 : index
    %c7_17 = arith.constant 7 : index
    %c0_18 = arith.constant 0 : index
    %26 = vector.load %arg4[%c0_15, %c1_16, %c7_17, %c0_18] : memref<1x3x8x128xf32, #tpu.memory_space<vmem>>, vector<1x1x1x128xf32>
    %27 = vector.shape_cast %26 : vector<1x1x1x128xf32> to vector<1x128xf32>
    %28 = arith.addf %25, %27 : vector<1x128xf32>
    %c0_19 = arith.constant 0 : index
    %c2_20 = arith.constant 2 : index
    %c7_21 = arith.constant 7 : index
    %c0_22 = arith.constant 0 : index
    %29 = vector.load %arg4[%c0_19, %c2_20, %c7_21, %c0_22] : memref<1x3x8x128xf32, #tpu.memory_space<vmem>>, vector<1x1x1x128xf32>
    %30 = vector.shape_cast %29 : vector<1x1x1x128xf32> to vector<1x128xf32>
    %31 = arith.addf %28, %30 : vector<1x128xf32>
    %cst_23 = arith.constant 0.333333343 : f32
    %32 = vector.broadcast %cst_23 : f32 to vector<1x128xf32>
    %33 = arith.mulf %31, %32 : vector<1x128xf32>
    %c0_24 = arith.constant 0 : index
    %c0_25 = arith.constant 0 : index
    %c0_26 = arith.constant 0 : index
    %c0_27 = arith.constant 0 : index
    %34 = vector.load %arg5[%c0_24, %c0_25, %c0_26, %c0_27] : memref<1x3x8x128xf32, #tpu.memory_space<vmem>>, vector<1x1x1x128xf32>
    %35 = vector.shape_cast %34 : vector<1x1x1x128xf32> to vector<1x128xf32>
    %c0_28 = arith.constant 0 : index
    %c1_29 = arith.constant 1 : index
    %c0_30 = arith.constant 0 : index
    %c0_31 = arith.constant 0 : index
    %36 = vector.load %arg5[%c0_28, %c1_29, %c0_30, %c0_31] : memref<1x3x8x128xf32, #tpu.memory_space<vmem>>, vector<1x1x1x128xf32>
    %37 = vector.shape_cast %36 : vector<1x1x1x128xf32> to vector<1x128xf32>
    %38 = arith.addf %35, %37 : vector<1x128xf32>
    %c0_32 = arith.constant 0 : index
    %c2_33 = arith.constant 2 : index
    %c0_34 = arith.constant 0 : index
    %c0_35 = arith.constant 0 : index
    %39 = vector.load %arg5[%c0_32, %c2_33, %c0_34, %c0_35] : memref<1x3x8x128xf32, #tpu.memory_space<vmem>>, vector<1x1x1x128xf32>
    %40 = vector.shape_cast %39 : vector<1x1x1x128xf32> to vector<1x128xf32>
    %41 = arith.addf %38, %40 : vector<1x128xf32>
    %cst_36 = arith.constant 0.333333343 : f32
    %42 = vector.broadcast %cst_36 : f32 to vector<1x128xf32>
    %43 = arith.mulf %41, %42 : vector<1x128xf32>
    %c0_i32 = arith.constant 0 : i32
    %44 = arith.cmpi eq, %arg1, %c0_i32 : i32
    %cst_37 = arith.constant 0.000000e+00 : f32
    %45 = vector.broadcast %cst_37 : f32 to vector<1x128xf32>
    %46 = arith.select %44, %45, %33 : vector<1x128xf32>
    %c0_i32_38 = arith.constant 0 : i32
    %47 = arith.cmpi eq, %arg1, %c0_i32_38 : i32
    %cst_39 = arith.constant 0.000000e+00 : f32
    %48 = vector.broadcast %cst_39 : f32 to vector<1x128xf32>
    %49 = arith.select %47, %48, %43 : vector<1x128xf32>
    %50 = tpu.iota {dimensions = array<i32: 0>} : vector<16x128xi32>
    %51 = tpu.iota {dimensions = array<i32: 1>} : vector<16x128xi32>
    %c0_i32_40 = arith.constant 0 : i32
    %52 = vector.broadcast %c0_i32_40 : i32 to vector<16x128xi32>
    %53 = arith.cmpi eq, %51, %52 : vector<16x128xi32>
    %c127_i32 = arith.constant 127 : i32
    %54 = vector.broadcast %c127_i32 : i32 to vector<16x128xi32>
    %55 = arith.cmpi eq, %51, %54 : vector<16x128xi32>
    %c0_i32_41 = arith.constant 0 : i32
    %56 = vector.broadcast %c0_i32_41 : i32 to vector<16x128xi32>
    %57 = arith.cmpi eq, %50, %56 : vector<16x128xi32>
    %c1_i32 = arith.constant 1 : i32
    %58 = tpu.dynamic_rotate %23 by %c1_i32 dim 0 : vector<16x128xf32>, i32 -> vector<16x128xf32>
    %59 = vector.shape_cast %46 : vector<1x128xf32> to vector<1x128xf32>
    %60 = vector.broadcast %59 : vector<1x128xf32> to vector<16x128xf32>
    %61 = arith.select %57, %60, %58 : vector<16x128xi1>, vector<16x128xf32>
    %c15_i32 = arith.constant 15 : i32
    %62 = vector.broadcast %c15_i32 : i32 to vector<16x128xi32>
    %63 = arith.cmpi eq, %50, %62 : vector<16x128xi32>
    %c15_i32_42 = arith.constant 15 : i32
    %64 = tpu.dynamic_rotate %23 by %c15_i32_42 dim 0 : vector<16x128xf32>, i32 -> vector<16x128xf32>
    %65 = vector.shape_cast %49 : vector<1x128xf32> to vector<1x128xf32>
    %66 = vector.broadcast %65 : vector<1x128xf32> to vector<16x128xf32>
    %67 = arith.select %63, %66, %64 : vector<16x128xi1>, vector<16x128xf32>
    %cst_43 = arith.constant 2.000000e+00 : f32
    %68 = vector.broadcast %cst_43 : f32 to vector<16x128xf32>
    %69 = arith.mulf %68, %23 : vector<16x128xf32>
    %70 = arith.addf %61, %69 : vector<16x128xf32>
    %71 = arith.addf %70, %67 : vector<16x128xf32>
    %72 = arith.subf %67, %61 : vector<16x128xf32>
    %c127_i32_44 = arith.constant 127 : i32
    %73 = tpu.dynamic_rotate %71 by %c127_i32_44 dim 1 : vector<16x128xf32>, i32 -> vector<16x128xf32>
    %cst_45 = arith.constant 0.000000e+00 : f32
    %74 = vector.broadcast %cst_45 : f32 to vector<16x128xf32>
    %75 = arith.select %55, %74, %73 : vector<16x128xi1>, vector<16x128xf32>
    %c1_i32_46 = arith.constant 1 : i32
    %76 = tpu.dynamic_rotate %71 by %c1_i32_46 dim 1 : vector<16x128xf32>, i32 -> vector<16x128xf32>
    %cst_47 = arith.constant 0.000000e+00 : f32
    %77 = vector.broadcast %cst_47 : f32 to vector<16x128xf32>
    %78 = arith.select %53, %77, %76 : vector<16x128xi1>, vector<16x128xf32>
    %79 = arith.subf %75, %78 : vector<16x128xf32>
    %c1_i32_48 = arith.constant 1 : i32
    %80 = tpu.dynamic_rotate %72 by %c1_i32_48 dim 1 : vector<16x128xf32>, i32 -> vector<16x128xf32>
    %cst_49 = arith.constant 0.000000e+00 : f32
    %81 = vector.broadcast %cst_49 : f32 to vector<16x128xf32>
    %82 = arith.select %53, %81, %80 : vector<16x128xi1>, vector<16x128xf32>
    %cst_50 = arith.constant 2.000000e+00 : f32
    %83 = vector.broadcast %cst_50 : f32 to vector<16x128xf32>
    %84 = arith.mulf %83, %72 : vector<16x128xf32>
    %85 = arith.addf %82, %84 : vector<16x128xf32>
    %c127_i32_51 = arith.constant 127 : i32
    %86 = tpu.dynamic_rotate %72 by %c127_i32_51 dim 1 : vector<16x128xf32>, i32 -> vector<16x128xf32>
    %cst_52 = arith.constant 0.000000e+00 : f32
    %87 = vector.broadcast %cst_52 : f32 to vector<16x128xf32>
    %88 = arith.select %55, %87, %86 : vector<16x128xi1>, vector<16x128xf32>
    %89 = arith.addf %85, %88 : vector<16x128xf32>
    %c0_53 = arith.constant 0 : index
    %c0_54 = arith.constant 0 : index
    %c0_55 = arith.constant 0 : index
    %c0_56 = arith.constant 0 : index
    %90 = vector.load %arg6[%c0_53, %c0_54, %c0_55, %c0_56] : memref<1x3x16x128xf32, #tpu.memory_space<vmem>>, vector<1x1x16x128xf32>
    %91 = vector.shape_cast %90 : vector<1x1x16x128xf32> to vector<16x128xf32>
    %92 = vector.shape_cast %19 : vector<16x128xf32> to vector<1x1x16x128xf32>
    tpu.vector_store %arg6[%c0_53, %c0_54, %c0_55, %c0_56], %92 {strides = array<i32>} : memref<1x3x16x128xf32, #tpu.memory_space<vmem>>, vector<1x1x16x128xf32>,
    %c0_57 = arith.constant 0 : index
    %c1_58 = arith.constant 1 : index
    %c0_59 = arith.constant 0 : index
    %c0_60 = arith.constant 0 : index
    %93 = vector.load %arg6[%c0_57, %c1_58, %c0_59, %c0_60] : memref<1x3x16x128xf32, #tpu.memory_space<vmem>>, vector<1x1x16x128xf32>
    %94 = vector.shape_cast %93 : vector<1x1x16x128xf32> to vector<16x128xf32>
    %95 = vector.shape_cast %79 : vector<16x128xf32> to vector<1x1x16x128xf32>
    tpu.vector_store %arg6[%c0_57, %c1_58, %c0_59, %c0_60], %95 {strides = array<i32>} : memref<1x3x16x128xf32, #tpu.memory_space<vmem>>, vector<1x1x16x128xf32>,
    %c0_61 = arith.constant 0 : index
    %c2_62 = arith.constant 2 : index
    %c0_63 = arith.constant 0 : index
    %c0_64 = arith.constant 0 : index
    %96 = vector.load %arg6[%c0_61, %c2_62, %c0_63, %c0_64] : memref<1x3x16x128xf32, #tpu.memory_space<vmem>>, vector<1x1x16x128xf32>
    %97 = vector.shape_cast %96 : vector<1x1x16x128xf32> to vector<16x128xf32>
    %98 = vector.shape_cast %89 : vector<16x128xf32> to vector<1x1x16x128xf32>
    tpu.vector_store %arg6[%c0_61, %c2_62, %c0_63, %c0_64], %98 {strides = array<i32>} : memref<1x3x16x128xf32, #tpu.memory_space<vmem>>, vector<1x1x16x128xf32>,
    return
  }
  func.func @transform_0(%arg0: i32, %arg1: i32) -> (i32, i32) {
    %c0_i32 = arith.constant 0 : i32
    %c0_i32_0 = arith.constant 0 : i32
    %c0_i32_1 = arith.constant 0 : i32
    return %c0_i32, %c0_i32_0 : i32, i32
  }
  func.func @transform_1(%arg0: i32, %arg1: i32) -> (i32, i32, i32, i32) {
    %c0_i32 = arith.constant 0 : i32
    %c0_i32_0 = arith.constant 0 : i32
    %c0_i32_1 = arith.constant 0 : i32
    return %arg0, %c0_i32, %arg1, %c0_i32_0 : i32, i32, i32, i32
  }
  func.func @transform_2(%arg0: i32, %arg1: i32) -> (i32, i32, i32, i32) {
    %c2_i32 = arith.constant 2 : i32
    %0 = arith.muli %arg1, %c2_i32 : i32
    %c1_i32 = arith.constant 1 : i32
    %1 = arith.subi %0, %c1_i32 : i32
    %c0_i32 = arith.constant 0 : i32
    %2 = arith.maxsi %1, %c0_i32 : i32
    %c0_i32_0 = arith.constant 0 : i32
    %c0_i32_1 = arith.constant 0 : i32
    %c0_i32_2 = arith.constant 0 : i32
    return %arg0, %c0_i32_0, %2, %c0_i32_1 : i32, i32, i32, i32
  }
  func.func @transform_3(%arg0: i32, %arg1: i32) -> (i32, i32, i32, i32) {
    %c1_i32 = arith.constant 1 : i32
    %0 = arith.addi %arg1, %c1_i32 : i32
    %c2_i32 = arith.constant 2 : i32
    %1 = arith.muli %0, %c2_i32 : i32
    %c1_i32_0 = arith.constant 1 : i32
    %2 = arith.minsi %1, %c1_i32_0 : i32
    %c0_i32 = arith.constant 0 : i32
    %c0_i32_1 = arith.constant 0 : i32
    %c0_i32_2 = arith.constant 0 : i32
    return %arg0, %c0_i32, %2, %c0_i32_1 : i32, i32, i32, i32
  }
  func.func @transform_4(%arg0: i32, %arg1: i32) -> (i32, i32, i32, i32) {
    %c0_i32 = arith.constant 0 : i32
    %c0_i32_0 = arith.constant 0 : i32
    %c0_i32_1 = arith.constant 0 : i32
    return %arg0, %c0_i32, %arg1, %c0_i32_0 : i32, i32, i32, i32
  }
}

</mosaic_0001>

<bundles_post_ra>
// kernel: tpu_custom_call.1
= control target key start
LH: loop header
LB: loop body
LE: loop exit
PB: predicated region body
PF: predicated region fallthrough
CT: control target
= control target key end

     0   :  { %s1304_s0 = inlined_call_operand.vmem [shape: f32[3,2], index: 0, kind: input, shape index: {}]   ;;  %s1305_s1 = inlined_call_operand.hbm [shape: f32[2,3,16,128], index: 1, kind: input, shape index: {}]   ;;  %s1306_s2 = inlined_call_operand.hbm [shape: f32[2,3,16,128], index: 2, kind: input, shape index: {}]   ;;  %s1307_s3 = inlined_call_operand.hbm [shape: f32[2,3,16,128], index: 3, kind: input, shape index: {}]   ;;  %s1308_s4 = inlined_call_operand.hbm [shape: f32[2,3,16,128], index: 4, kind: output, shape index: {}]  }
   0x1   :  { %1320 = sst [smem:[#allocation19_spill]] %s1304_s0 }
   0x2   :  { %1321 = sst [smem:[#allocation20_spill]] %s1305_s1 }
   0x3   :  { %1322 = sst [smem:[#allocation21_spill]] %s1306_s2 }
   0x4   :  { %9 = vsyncpa [#allocation5], 0 }
   0x5   :  { %10 = vsyncpa [#allocation3], 0 }
   0x6   :  { %12 = vsyncpa [#allocation3 + $0x1], 0 }
   0x7   :  { %13 = vsyncpa [#allocation8], 0 }
   0x8   :  { %15 = vsyncpa [#allocation8 + $0x1], 0 }
   0x9   :  { %16 = vsyncpa [#allocation4], 0 }
   0xa   :  { %18 = vsyncpa [#allocation4 + $0x1], 0  ;;  %s1030_s15 = smov 0   ;;  %s1032_s16 = smov 0  }
   0xb   :  { %s1034_s17 = smov 0   ;;  %s1036_s18 = smov 0  }
   0xc   :  { %s1038_s19 = smov 0   ;;  %s1040_s20 = smov 0  }
   0xd LB: > { %1323 = sst [smem:[#allocation15_spill]] %s978_s17  ;;  %s36_s21 = sadd.s32 1, %s986_s19  ;;  %s990_s20 = sphi %s1040_s20, %s24_s20   ;;  %s986_s19 = sphi %s1038_s19, %s1350_s19   ;;  %s982_s18 = sphi %s1036_s18, %s1349_s18   ;;  %s978_s17 = sphi %s1034_s17, %s1348_s17   ;;  %s974_s16 = sphi %s1032_s16, %s1352_s16   ;;  %s970_s15 = sphi %s1030_s15, %s1351_s15  }
   0xe   : > { %1324 = sst [smem:[#allocation16_spill]] %s986_s19  ;;  %s66_s22 = sadd.s32 1, %s978_s17 }
   0xf   : > { %p38_p0 = scmp.ge.s32.totalorder %s36_s21, 2  ;;  %p73_p1 = scmp.ne.s32.totalorder %s978_s17, %s974_s16 }
  0x10   : > { %p74_p2 = scmp.eq.s32.totalorder %s990_s20, 0  ;;  %p742_p5 = scmp.lt.s32.totalorder %s990_s20, 2 }
  0x11   : > { %s1354_s21 = smov (%p38_p0, %s36_s21), 0  ;;  %s1075_s24 = sand.u32 1, %s978_s17  }
  0x12   : > { %1325 = sst [smem:[#allocation17_spill]] %s1354_s21  ;;  %p75_p4 = por %p74_p2, %p73_p1 }
  0x13   : > { %s61_s23 = ssub.s32 %s986_s19, %s1354_s21  ;;  %s1078_s25 = smul.u32 768, %s986_s19 }
  0x14   : > { %p64_p6 = scmp.eq.s32.totalorder %s61_s23, 0  ;;  %p1080_p7 = pnand %p742_p5, %p75_p4 }
  0x15   : > { %s237_s28 = sand.u32 1, %s990_s20   ;;  %s1310_s29 = smul.u32 24, %s1075_s24 }
  0x16   : > { %s1085_s27 = scalar_select %p64_p6, %s978_s17, %s66_s22  }
  0x17   : > { %s1328_s2 = sld [smem:[#allocation21_spill]]  ;;  %s241_s7 = scalar_lea.vmem [#allocation7], %s1310_s29 }
  0x18   : > { %1327 = sst [smem:[#allocation18_spill]] %s1085_s27  ;;  %s253_s8 = sshll.u32 %s241_s7, 4  ;;  %s254_s8 = int_to_ptr.vmem [resolvable:$true] %s253_s8 }
  0x19   : > { %s1095_s9 = scalar_lea.sflag [#allocation8], %s237_s28  ;;  %p1315_p8 = pneg %p1080_p7 }
  0x1a   : > { %s816_s10 = scalar_lea.vmem %s254_s8, 384  ;;  %s992_s11 = smov [#allocation7]  }
  0x1b   : > { %p817_p9 = scmp.ne.s32.totalorder %s254_s8, %s816_s10  ;;  %s821_s12 = sshll.u32 %s992_s11, 4  ;;  %s822_s12 = int_to_ptr.vmem [resolvable:$false] %s821_s12 }
  0x1c   : > { %s823_s13 = scalar_lea.vmem %s822_s12, 768  ;;  %p824_p12 = scmp.lt.s32.totalorder %s254_s8, %s822_s12 }
  0x1d   : > { %s252_s6 = scalar_lea.hbm %s1328_s2, %s1078_s25  ;;  %p819_p10 = pnand %p817_p9, %p1315_p8 }
  0x1e   : > { %p825_p13 = scmp.lt.s32.totalorder %s823_s13, %s816_s10 }
  0x1f   : > { %p820_p11 = pneg %p819_p10 }
  0x20   : > { %p826_p0 = por %p825_p13, %p824_p12 }
  0x22   : > { %p827_p2 = pnand %p826_p0, %p820_p11 }
  0x24   : > { %830 = shalt.err (!%p827_p2)
}
  0x25   : > { %s1309_s14 = smov 256   ;;  %s1311_s22 = smov 128  }
  0x26   : > { %s1313_s23 = smov 8   ;;  %s1109_s28 = sadd.s32 4294967295, %s990_s20  }
  0x27   : > { %733 = dma.hbm_to_vmem [thread:$0]  (!%p1080_p7), %s252_s6, 384, %s254_s8, %s1095_s9, %s1309_s14, %s1311_s22, %s1313_s23  }
  0x28   : > { %s671_s30 = sadd.s32 4294967294, %s990_s20   ;;  %p79_p4 = scmp.ne.s32.totalorder %s974_s16, %s970_s15 }
  0x29   : > { %p80_p5 = scmp.eq.s32.totalorder %s1109_s28, 0  ;;  %p177_p6 = scmp.eq.s32.totalorder %s1109_s28, 1 }
  0x2a   : > { %p183_p9 = scmp.eq.s32.totalorder %s671_s30, 1  ;;  %p672_p10 = scmp.ge.s32.totalorder %s990_s20, 1 }
  0x2b   : > { %p1119_p11 = por %p80_p5, %p79_p4  ;;  %p1126_p12 = por %p177_p6, %p73_p1 }
  0x2c   : > { %p1130_p13 = por %p183_p9, %p79_p4  ;;  %p190_p0 = scmp.lt.s32.totalorder %s990_s20, 3 }
  0x2d   : > { %s1330_s6 = scalar_select %p1126_p12, 1, 0 }
  0x2e   : > { %s1331_s7 = scalar_select %p1130_p13, 1, 0 }
  0x2f   : > { %s1332_s0 = sld [smem:[#allocation19_spill]]  ;;  %p1138_p2 = pnand %p672_p10, %p190_p0 }
  0x30   : > { %s703_s13 = smul.u32 48, %s1075_s24  ;;  %s1334_s1 = sld [smem:[#allocation20_spill]] }
  0x31   : > { %p723_p1 = pneg %p1138_p2 }
  0x32   : > { %s218_s8 = scalar_lea.vmem [#allocation6], %s703_s13 }
  0x33   : > { %p1151_p4 = pnand %p723_p1, %p80_p5  ;;  %s227_s10 = sshll.u32 %s218_s8, 4  ;;  %s1156_s10 = int_to_ptr.vmem [resolvable:$true] %s227_s10 }
  0x35   : > { %s203_s11 = sshll.u32 %s1332_s0, 4  ;;  %p833_p9 = pneg %p1151_p4  ;;  %s204_s11 = int_to_ptr.vmem [resolvable:$true] %s203_s11 }
  0x36   : > { %s831_s0 = scalar_lea.vmem %s204_s11, 64  ;;  %p839_p3 = scmp.lt.s32.totalorder %s204_s11, %s204_s11 }
  0x37   : > { %p832_p6 = scmp.ne.s32.totalorder %s204_s11, %s831_s0  ;;  %p840_p8 = scmp.lt.s32.totalorder %s831_s0, %s831_s0 }
  0x39   : > { %p834_p10 = pnand %p833_p9, %p832_p6  ;;  %p841_p13 = por %p840_p8, %p839_p3 }
  0x3b   : > { %p835_p0 = pneg %p834_p10 }
  0x3d   : > { %p842_p12 = pnand %p841_p13, %p835_p0 }
  0x3f   : > { %845 = shalt.err (!%p842_p12)
}
  0x40   : > { %s996_s14 = smov [#allocation2]   ;;  %s215_s13 = scalar_lea.sflag [#allocation3], %s1075_s24 }
  0x41   : > { %726 = dma.vmem_to_smem (!%p1151_p4), %s204_s11, 64, %s996_s14, [#allocation5]  }
  0x42   : > { %s859_s30 = scalar_lea.vmem %s1156_s10, 768  ;;  %p1336_p6 = pneg %p1080_p7 }
  0x43   : > { %p860_p1 = scmp.ne.s32.totalorder %s1156_s10, %s859_s30  ;;  %s997_s0 = smov [#allocation6]  }
  0x44   : > { %s864_s8 = sshll.u32 %s997_s0, 4  ;;  %s865_s8 = int_to_ptr.vmem [resolvable:$false] %s864_s8 }
  0x45   : > { %p862_p9 = pnand %p860_p1, %p1336_p6  ;;  %s866_s23 = scalar_lea.vmem %s865_s8, 1536 }
  0x46   : > { %p867_p3 = scmp.lt.s32.totalorder %s1156_s10, %s865_s8  ;;  %p868_p8 = scmp.lt.s32.totalorder %s866_s23, %s859_s30 }
  0x47   : > { %p863_p10 = pneg %p862_p9 }
  0x48   : > { %p869_p12 = por %p868_p8, %p867_p3 }
  0x4a   : > { %p870_p13 = pnand %p869_p12, %p863_p10 }
  0x4c   : > { %873 = shalt.err (!%p870_p13)
}
  0x4d   : > { %s1337_s22 = smov 8   ;;  %s1338_s11 = smov 128  }
  0x4e   : > { %s1339_s2 = scalar_lea.hbm %s1334_s1, %s1078_s25  ;;  %s1340_s0 = sadd.s32 128, %s1078_s25 }
  0x4f   : > { %730 = dma.hbm_to_vmem [thread:$0]  (!%p1080_p7), %s1339_s2, 768, %s1156_s10, %s215_s13, %s1338_s11, %s1338_s11, %s1337_s22  }
  0x50   : > { %s278_s8 = scalar_lea.hbm %s1307_s3, %s1340_s0  ;;  %s1341_s21 = smul.u32 24, %s1075_s24 }
  0x51   : > { %p1342_p0 = pmov %p1336_p6  ;;  %s998_s29 = smov [#allocation9]  }
  0x52   : > { %s267_s19 = scalar_lea.vmem [#allocation9], %s1341_s21  ;;  %s892_s14 = sshll.u32 %s998_s29, 4  ;;  %s893_s14 = int_to_ptr.vmem [resolvable:$false] %s892_s14 }
  0x53   : > { %s279_s27 = sshll.u32 %s267_s19, 4  ;;  %s894_s1 = scalar_lea.vmem %s893_s14, 768  ;;  %s280_s27 = int_to_ptr.vmem [resolvable:$true] %s279_s27 }
  0x54   : > { %s887_s17 = scalar_lea.vmem %s280_s27, 384  ;;  %p895_p9 = scmp.lt.s32.totalorder %s280_s27, %s893_s14 }
  0x55   : > { %p888_p4 = scmp.ne.s32.totalorder %s280_s27, %s887_s17  ;;  %p896_p10 = scmp.lt.s32.totalorder %s894_s1, %s887_s17 }
  0x57   : > { %p890_p1 = pnand %p888_p4, %p1342_p0  ;;  %p897_p3 = por %p896_p10, %p895_p9 }
  0x59   : > { %p891_p6 = pneg %p890_p1 }
  0x5b   : > { %p898_p8 = pnand %p897_p3, %p891_p6 }
  0x5d   : > { %901 = shalt.err (!%p898_p8)
}
  0x5e   : > { %s1343_s2 = smov 256   ;;  %291 = sbr.rel (%p1138_p2) target bundleno = 271 (0x10f), region = 36 }
  0x5f   : > { %736 = dma.hbm_to_vmem [thread:$0]  (!%p1080_p7), %s278_s8, 384, %s280_s27, %s1095_s9, %s1343_s2, %s1338_s11, %s1337_s22  }
  0x63   : > { %953 = dma.done.wait (%p80_p5), [#allocation5], 64  }
  0x64   : > { %955 = vsyncadd (%p80_p5), [#allocation5], 4294967232  ;;  %s1203_s1 = sand.u32 1, %s974_s16  }
  0x65   : > { %s709_s17 = smul.u32 48, %s1203_s1  ;;  %s298_s19 = scalar_lea.sflag [#allocation3], %s1203_s1 }
  0x67   : > { %s301_s21 = scalar_lea.vmem [#allocation6], %s709_s17 }
  0x68   : > { %957 = dma.done.wait (%p1119_p11), %s298_s19, 768  }
  0x69   : > { %959 = vsyncadd (%p1119_p11), %s298_s19, 4294966528  ;;  %s306_s24 = sand.u32 1, %s1109_s28  }
  0x6a   : > { %s307_s25 = scalar_lea.sflag [#allocation8], %s306_s24 }
  0x6b   : > { %961 = dma.done.wait (%p1119_p11), %s307_s25, 768  }
  0x6c   : > { %963 = vsyncadd (%p1119_p11), %s307_s25, 4294966528 }
  0x6d   : > { %324 = sfence }
  0x6e   : > { %v365_v0 = vld [vmem:[%s301_s21] sm:$0xff]  ;;  %v366_v1 = vld [vmem:[%s301_s21 + $0x8] sm:$0xff]  ;;  %v680_v2 = vld [vmem:[%s301_s21 + $0x10] sm:$0xff]  ;;  %s1219_s26 = sld [smem:[#allocation2 + %s982_s18]]  ;;  %s374_s27 = sshra.s32 %s982_s18, 7  ;;  %v427_v3 = vlaneseq  ;;  %v999_v18 = vmov 0.0  }
  0x6f   : > { %v681_v4 = vld [vmem:[%s301_s21 + $0x18] sm:$0xff]  ;;  %v682_v5 = vld [vmem:[%s301_s21 + $0x20] sm:$0xff]  ;;  %v683_v6 = vld [vmem:[%s301_s21 + $0x28] sm:$0xff]  ;;  %s699_s9 = sshll.u32 %s374_s27, 7  ;;  %s379_s28 = sand.u32 127, %s982_s18  ;;  %v399_v7 = vadd.f32 %v680_v2, %v365_v0 }
  0x70   : > { %s700_s5 = sadd.s32 128, %s699_s9  ;;  %s702_s12 = sadd.s32 256, %s699_s9  ;;  %v400_v8 = vadd.f32 %v681_v4, %v366_v1  ;;  %v428_v9 = vshrl.u32 %v427_v3, 7  ;;  %v431_v49 = vand.u32 127, %v427_v3 }
  0x71   : > { %s380_s10 = sadd.s32 %s700_s5, %s379_s28  ;;  %s384_s13 = sadd.s32 %s702_s12, %s379_s28  ;;  %v401_v10 = vadd.f32 %v682_v5, %v399_v7 }
  0x72   : > { %s381_s22 = sld [smem:[#allocation2 + %s380_s10]]  ;;  %v402_v11 = vadd.f32 %v683_v6, %v400_v8  ;;  %v443_v12 = vsub.s32 0, %v428_v9  ;;  %v429_v14 = vadd.s32 8, %v428_v9  ;;  %vm438_vm0 = vcmp.lt.s32.totalorder %v428_v9, 1  ;;  %s1000_s0 = smov 1  }
  0x73   : > { %s385_s11 = sld [smem:[#allocation2 + %s384_s13]]  ;;  %v403_v13 = vmul.f32 0.33333334, %v401_v10  ;;  %vm451_vm1 = vcmp.lt.s32.totalorder %v428_v9, 7  ;;  %vm434_vm2 = vcmp.eq.s32.totalorder %v428_v9, 0  ;;  %s1001_s23 = smov 127  }
  0x74   : > { %v386_v15 = vstv %s1219_s26  ;;  %v404_v16 = vmul.f32 0.33333334, %v402_v11  ;;  %v444_v19 = vrot.slane %v999_v18, %v443_v12  ;;  %vm448_vm3 = vcmp.eq.s32.totalorder %v429_v14, 15  ;;  %s1232_s30 = scalar_lea.vmem [#allocation10], %s709_s17  ;;  %s710_s29 = smul.u32 768, %s982_s18 }
  0x75   : > { %v436_v17 = vrot.slane %v403_v13, 7  ;;  %v449_v20 = vrot.slane %v403_v13, 1  ;;  %v388_v21 = vmul.f32 %v386_v15, %v366_v1  ;;  %v387_v24 = vmul.f32 %v386_v15, %v365_v0  ;;  %s524_s8 = sshll.u32 %s1232_s30, 4  ;;  %s509_s18 = scalar_lea.sflag [#allocation4], %s1203_s1  ;;  %s1247_s8 = int_to_ptr.vmem [resolvable:$true] %s524_s8 }
  0x76   : > { %v437_v22 = vrot.slane %v404_v16, 7  ;;  %v450_v23 = vrot.slane %v404_v16, 1  ;;  %v461_v25 = vmul.f32 2.0, %v404_v16  ;;  %v460_v26 = vmul.f32 2.0, %v403_v13  ;;  %s1255_s17 = scalar_lea.hbm %s1308_s4, %s710_s29  ;;  %s902_s19 = scalar_lea.vmem %s1247_s8, 768 }
  0x77   : > { %vm432_vm4 = vcmp.eq.s32.totalorder %v431_v49, 0  ;;  %vm433_vm5 = vcmp.eq.s32.totalorder %v431_v49, 127  ;;  %p903_p7 = scmp.ne.s32.totalorder %s1247_s8, %s902_s19  ;;  %p1344_p5 = scmp.ne.s32.totalorder %s1330_s6, 0 }
  0x78   : > { %v389_v27 = vstv %s381_s22  ;;  %v440_v28 = vsel %vm438_vm0, %v437_v22, %v436_v17  ;;  %v452_v29 = vsel %vm451_vm1, %v449_v20, %v450_v23  ;;  %v439_v30 = vsel %vm438_vm0, %v436_v17, %v437_v22  ;;  %s1002_s21 = smov [#allocation10]  }
  0x79   : > { %v390_v31 = vmul.f32 %v680_v2, %v389_v27  ;;  %v391_v32 = vmul.f32 %v681_v4, %v389_v27  ;;  %v394_v33 = vstv %s385_s11  ;;  %v445_v34 = vsel %vm434_vm2, %v444_v19, %v440_v28  ;;  %p904_p11 = pnand %p903_p7, %p1344_p5  ;;  %s906_s24 = sshll.u32 %s1002_s21, 4  ;;  %s907_s24 = int_to_ptr.vmem [resolvable:$false] %s906_s24 }
  0x7a   : > { %v395_v35 = vmul.f32 %v682_v5, %v394_v33  ;;  %v396_v36 = vmul.f32 %v683_v6, %v394_v33  ;;  %v466_v37 = vsub.f32 %v452_v29, %v445_v34  ;;  %v453_v38 = vsel %vm451_vm1, %v450_v23, %v449_v20  ;;  %s908_s25 = scalar_lea.vmem %s907_s24, 1536  ;;  %p909_p12 = scmp.lt.s32.totalorder %s1247_s8, %s907_s24 }
  0x7b   : > { %v393_v39 = vadd.f32 %v391_v32, %v388_v21  ;;  %v392_v40 = vadd.f32 %v390_v31, %v387_v24  ;;  %v459_v41 = vsel %vm448_vm3, %v444_v19, %v453_v38  ;;  %v463_v42 = vadd.f32 %v461_v25, %v439_v30  ;;  %p905_p2 = pneg %p904_p11  ;;  %p910_p13 = scmp.lt.s32.totalorder %s908_s25, %s902_s19 }
  0x7c   : > { %482 = vrot.lane.b32.xlu0 %v466_v37, %s1000_s0  ;;  %v467_v43 = vsub.f32 %v459_v41, %v439_v30  ;;  %v462_v44 = vadd.f32 %v460_v26, %v445_v34  ;;  %v488_v50 = vmul.f32 2.0, %v466_v37 }
  0x7d   : > { %v398_v45 = vadd.f32 %v396_v36, %v393_v39  ;;  %v397_v46 = vadd.f32 %v395_v35, %v392_v40  ;;  %v465_v47 = vadd.f32 %v463_v42, %v459_v41  ;;  %p911_p4 = por %p910_p13, %p909_p12 }
  0x7e   : > { %v464_v48 = vadd.f32 %v462_v44, %v452_v29  ;;  %v489_v54 = vmul.f32 2.0, %v467_v43 }
  0x7f   : > { %470 = vrot.lane.b32.xlu1 %v465_v47, %s1001_s23  ;;  %500 = vst [vmem:[%s1232_s30] sm:$0xff] %v397_v46  ;;  %501 = vst [vmem:[%s1232_s30 + $0x8] sm:$0xff] %v398_v45  ;;  %p912_p0 = pnand %p911_p4, %p905_p2 }
  0x80   : > { %484 = vrot.lane.b32.xlu0 %v467_v43, %s1000_s0 }
  0x83   : > { %476 = vrot.lane.b32.xlu1 %v465_v47, %s1000_s0 }
  0x84   : > { %474 = vrot.lane.b32.xlu0 %v464_v48, %s1000_s0 }
  0x87   : > { %468 = vrot.lane.b32.xlu1 %v464_v48, %s1001_s23 }
  0x88   : > { %492 = vrot.lane.b32.xlu0 %v466_v37, %s1001_s23 }
  0x8b   : > { %494 = vrot.lane.b32.xlu1 %v467_v43, %s1001_s23 }
  0xee   : > { %v483_v51 = vpop.permute.xlu0 %482 }
  0xef   : > { %v486_v52 = vsel %vm432_vm4, 0.0, %v483_v51 }
  0xf0   : > { %v490_v53 = vadd.f32 %v488_v50, %v486_v52 }
  0xf1   : > { %v471_v55 = vpop.permute.xlu1 %470 }
  0xf2   : > { %v485_v56 = vpop.permute.xlu0 %484  ;;  %v473_v60 = vsel %vm433_vm5, 0.0, %v471_v55 }
  0xf3   : > { %v487_v57 = vsel %vm432_vm4, 0.0, %v485_v56 }
  0xf4   : > { %v491_v58 = vadd.f32 %v489_v54, %v487_v57 }
  0xf5   : > { %v477_v59 = vpop.permute.xlu1 %476 }
  0xf6   : > { %v479_v61 = vsel %vm432_vm4, 0.0, %v477_v59  ;;  %v475_v62 = vpop.permute.xlu0 %474 }
  0xf7   : > { %v481_v63 = vsub.f32 %v473_v60, %v479_v61  ;;  %v478_v0 = vsel %vm432_vm4, 0.0, %v475_v62 }
  0xf9   : > { %691 = vst [vmem:[%s1232_s30 + $0x18] sm:$0xff] %v481_v63  ;;  %v469_v1 = vpop.permute.xlu1 %468 }
  0xfa   : > { %v472_v2 = vsel %vm433_vm5, 0.0, %v469_v1  ;;  %v493_v3 = vpop.permute.xlu0 %492 }
  0xfb   : > { %v480_v4 = vsub.f32 %v472_v2, %v478_v0  ;;  %v496_v5 = vsel %vm433_vm5, 0.0, %v493_v3 }
  0xfc   : > { %v498_v6 = vadd.f32 %v496_v5, %v490_v53 }
  0xfd   : > { %690 = vst [vmem:[%s1232_s30 + $0x10] sm:$0xff] %v480_v4  ;;  %v495_v7 = vpop.permute.xlu1 %494 }
  0xfe   : > { %692 = vst [vmem:[%s1232_s30 + $0x20] sm:$0xff] %v498_v6  ;;  %v497_v8 = vsel %vm433_vm5, 0.0, %v495_v7 }
  0xff   : > { %v499_v9 = vadd.f32 %v497_v8, %v491_v58 }
 0x101   : > { %693 = vst [vmem:[%s1232_s30 + $0x28] sm:$0xff] %v499_v9 }
 0x102   : > { %915 = shalt.err (!%p912_p0)
}
 0x103   : > { %s916_s26 = scalar_lea.hbm %s1255_s17, 768  ;;  %s920_s28 = scalar_lea.hbm %s1308_s4, 1536 }
 0x104   : > { %p917_p1 = scmp.ne.s32.totalorder %s1255_s17, %s916_s26  ;;  %p921_p10 = scmp.lt.s32.totalorder %s1255_s17, %s1308_s4 }
 0x105   : > { %p922_p3 = scmp.lt.s32.totalorder %s920_s28, %s916_s26 }
 0x106   : > { %p918_p6 = pnand %p917_p1, %p1344_p5 }
 0x107   : > { %p923_p8 = por %p922_p3, %p921_p10 }
 0x108   : > { %p919_p9 = pneg %p918_p6 }
 0x10a   : > { %p924_p7 = pnand %p923_p8, %p919_p9 }
 0x10c   : > { %927 = shalt.err (!%p924_p7)
}
 0x10d   : > { %s1003_s10 = smov 128   ;;  %s1004_s13 = smov 8  }
 0x10e   : > { %721 = dma.vmem_to_hbm [thread:$0]  (%p1344_p5), %s1247_s8, 768, %s1255_s17, %s509_s18, %s1003_s10, %s1003_s10, %s1004_s13  }
 0x10f PF: > { %s539_s22 = sand.u32 1, %s970_s15   ;;  %p1345_p11 = scmp.ne.s32.totalorder %s1331_s7, 0 }
 0x110   : > { %p1346_p2 = scmp.ge.s32.totalorder %s990_s20, 2  ;;  %s540_s11 = scalar_lea.sflag [#allocation4], %s539_s22 }
 0x112   : > { %p738_p12 = pnand %p1346_p2, %p1345_p11 }
 0x114   : > { %p739_p13 = pneg %p738_p12 }
 0x116   : > { %965 = dma.done.wait (%p739_p13), %s540_s11, 768  }
 0x117   : > { %967 = vsyncadd (%p739_p13), %s540_s11, 4294966528  ;;  %s24_s20 = sadd.s32 1, %s990_s20   ;;  %s1347_s0 = sld [smem:[#allocation15_spill]] }
 0x118   : > { %p21_p4 = scmp.ge.s32.totalorder %s24_s20, 4   ;;  %s1348_s17 = sld [smem:[#allocation18_spill]] }
 0x119   : > { %s1349_s18 = sld [smem:[#allocation16_spill]]  ;;  %s1351_s15 = smov %s974_s16 }
 0x11a   : > { %s1350_s19 = sld [smem:[#allocation17_spill]]  ;;  %23 = sbr.rel (!%p21_p4) target bundleno = 13 (0xd), region = 118 }
 0x11d   : > { %s1352_s16 = smov %s1347_s0 }
 0x11f   :  { %545 = vsyncpa [#allocation3], 1 }
 0x120   :  { %547 = vsyncpa [#allocation3 + $0x1], 1 }
 0x121   :  { %548 = vsyncpa [#allocation8], 1 }
 0x122   :  { %550 = vsyncpa [#allocation8 + $0x1], 1 }
 0x123   :  { %551 = vsyncpa [#allocation4], 1 }
 0x124   :  { %553 = vsyncpa [#allocation4 + $0x1], 1 }
 0x125   :  { %554 = vsyncpa [#allocation5], 1 }
 0x126   :  { %556 = vsyncpa [#allocation5 + $0x1], 1 }

</bundles_post_ra>
